<compile_context>
chip_gen: v6e
topology: v6e:2x2x1
jax: 0.10.0
libtpu: 0.0.40
codegen_flags: <defaults>
</compile_context>

<pallas_src>
import functools

import numpy as np

import jax
import jax.numpy as jnp
from jax.experimental import pallas as pl
from jax.experimental.pallas import tpu as pltpu


# ---------------------------------------------------------------------------
# Kernels
# ---------------------------------------------------------------------------

def _sigmatrix_kernel(w0_ref, w1_ref, w2_ref, w3_ref, w4_ref, sig_ref):
    """sigmatrix = relu(w0 @ w1 @ w2 @ w3 @ w4), all in f32.

    Cold, z-independent kernel.  Left-to-right association keeps M = input_dim
    (cheapest MAC count).  Intermediates stay f32: the kernel is DMA-dominated
    (w3/w4 ~1 MiB), so bf16 re-packs save nothing and only cost accuracy.
    """
    w01 = jnp.dot(w0_ref[...], w1_ref[...], preferred_element_type=jnp.float32)
    w02 = jnp.dot(w01, w2_ref[...], preferred_element_type=jnp.float32)
    w03 = jnp.dot(w02, w3_ref[...], preferred_element_type=jnp.float32)
    w04 = jnp.dot(w03, w4_ref[...], preferred_element_type=jnp.float32)
    sig_ref[...] = jnp.maximum(w04, 0.0)          # F.relu


def _recon_kernel(z_ref, sig_ref, xrec_ref):
    """x_recon = z @ sigmatrix.  Inputs arrive bf16; accumulation is f32."""
    xrec_ref[...] = jnp.dot(
        z_ref[...], sig_ref[...], preferred_element_type=jnp.float32
    ).astype(xrec_ref.dtype)


# ---------------------------------------------------------------------------
# Wrappers
# ---------------------------------------------------------------------------

def _full_spec(shape):
    # Single full-array block (block_shape == array shape satisfies tiling rule).
    return pl.BlockSpec(shape, lambda: (0,) * len(shape))


@jax.jit
def compute_sigmatrix(w0_T, w1_T, w2_T, w3_T, w4_T):
    """z-independent kernel: call once per weight update and cache the result."""
    input_dim = w0_T.shape[0]
    output_dim = w4_T.shape[1]
    ws = (w0_T, w1_T, w2_T, w3_T, w4_T)

    flops = sum(2 * input_dim * w.shape[0] * w.shape[1] for w in ws[1:])
    bytes_accessed = sum(w.size * 4 for w in ws) + input_dim * output_dim * 4

    return pl.pallas_call(
        _sigmatrix_kernel,
        out_shape=jax.ShapeDtypeStruct((input_dim, output_dim), jnp.float32),
        in_specs=[_full_spec(w.shape) for w in ws],
        out_specs=_full_spec((input_dim, output_dim)),
        cost_estimate=pl.CostEstimate(
            flops=flops, transcendentals=0, bytes_accessed=bytes_accessed),
    )(*ws)


_ROW_MULTIPLE_BF16 = 16   # bf16 packs 2 rows per sublane -> tiles in multiples of 16
_PALLAS_MIN_ROWS = 512    # below this, pallas dispatch overhead dominates -> use XLA


def _pick_batch_block(batch, row_multiple=_ROW_MULTIPLE_BF16):
    """Batch tile for the recon grid.

    Multiple of `row_multiple`, divides `batch`, capped at 512 rows and at
    batch//4 so the grid has >=2 (ideally >=4) steps: that keeps both v7x
    TensorCores busy and lets writeback of step i-1 overlap compute of step i.
    """
    if batch <= row_multiple or batch % row_multiple != 0:
        return batch                       # single full-batch block (legal)
    cap = min(512, batch // 2)             # at least 2 grid steps
    if batch >= 4 * row_multiple:
        cap = min(cap, max(row_multiple, batch // 4))   # >=4 steps when possible
    cap = max(cap, row_multiple)
    tb = (cap // row_multiple) * row_multiple
    while tb > row_multiple and batch % tb != 0:
        tb -= row_multiple
    if batch % tb != 0:
        return batch
    return tb


@functools.partial(jax.jit, static_argnames=("out_dtype",))
def _reconstruct_pallas(z, sigmatrix, out_dtype=jnp.float32):
    """Hot per-call kernel: x_recon = z @ sigmatrix, gridded over batch."""
    batch, input_dim = z.shape
    output_dim = sigmatrix.shape[1]

    # bf16 at the boundary: halves z/sigmatrix HBM reads and makes the matmul
    # a single-pass bf16 MXU op.  Accumulation stays f32 inside the kernel.
    z_b = z.astype(jnp.bfloat16)
    sig_b = sigmatrix.astype(jnp.bfloat16)

    tb = _pick_batch_block(batch)
    out_itemsize = jnp.dtype(out_dtype).itemsize
    cost = pl.CostEstimate(
        flops=2 * batch * input_dim * output_dim,
        transcendentals=0,
        bytes_accessed=(z_b.size + sig_b.size) * 2
        + batch * output_dim * out_itemsize,
    )

    return pl.pallas_call(
        _recon_kernel,
        out_shape=jax.ShapeDtypeStruct((batch, output_dim), out_dtype),
        grid=(batch // tb,),
        in_specs=[
            pl.BlockSpec((tb, input_dim), lambda i: (i, 0)),
            pl.BlockSpec((input_dim, output_dim), lambda i: (0, 0)),
        ],
        # output_dim kept as the full lane dimension -> unmasked stores.
        out_specs=pl.BlockSpec((tb, output_dim), lambda i: (i, 0)),
        compiler_params=pltpu.CompilerParams(
            dimension_semantics=("parallel",)),   # megacore sharding on v7x
        cost_estimate=cost,
    )(z_b, sig_b)


@functools.partial(jax.jit, static_argnames=("out_dtype",))
def _reconstruct_xla(z, sigmatrix, out_dtype=jnp.float32):
    """Small-batch path: let XLA fuse the tiny matmul (same numerics)."""
    return jnp.dot(
        z.astype(jnp.bfloat16), sigmatrix.astype(jnp.bfloat16),
        preferred_element_type=jnp.float32,
    ).astype(out_dtype)


def reconstruct(z, sigmatrix, *, out_dtype=jnp.float32, use_pallas=None):
    """x_recon = z @ sigmatrix; dispatches Pallas vs fused-XLA by batch size."""
    if use_pallas is None:
        use_pallas = z.shape[0] >= _PALLAS_MIN_ROWS
    fn = _reconstruct_pallas if use_pallas else _reconstruct_xla
    return fn(z, sigmatrix, out_dtype=out_dtype)


def channel_decoder_forward(z, w0_T, w1_T, w2_T, w3_T, w4_T, sigmatrix=None,
                            *, out_dtype=jnp.float32, use_pallas_recon=None):
    """ChannelDecoder.forward.  Returns (x_recon, sigmatrix).

    Pass a previously computed `sigmatrix` to skip the (z-independent) weight
    chain when the weights have not changed.
    """
    if sigmatrix is None:
        sigmatrix = compute_sigmatrix(w0_T, w1_T, w2_T, w3_T, w4_T)
    x_recon = reconstruct(z, sigmatrix, out_dtype=out_dtype,
                          use_pallas=use_pallas_recon)
    return x_recon, sigmatrix


# ---------------------------------------------------------------------------
# Demo / self-test
# ---------------------------------------------------------------------------

if __name__ == "__main__":
    # Deterministic synthetic parameters / inputs (no checkpoint loading).
    batch = 64
    input_dim = 16     # e.g. number of cell types
    output_dim = 256   # e.g. number of CpG features

    key = jax.random.PRNGKey(0)
    kz, k0, k1, k2, k3, k4 = jax.random.split(key, 6)

    z = jax.random.normal(kz, (batch, input_dim), dtype=jnp.float32)
    # nn.Linear(in, out) weight has shape (out, in); we store the transposed
    # weights directly (as used by sigmatrix()).
    w0_T = jax.random.normal(k0, (input_dim, 64), dtype=jnp.float32) * 0.1
    w1_T = jax.random.normal(k1, (64, 128), dtype=jnp.float32) * 0.1
    w2_T = jax.random.normal(k2, (128, 256), dtype=jnp.float32) * 0.1
    w3_T = jax.random.normal(k3, (256, 512), dtype=jnp.float32) * 0.1
    w4_T = jax.random.normal(k4, (512, output_dim), dtype=jnp.float32) * 0.1

    # 1) Full forward (Pallas sigmatrix kernel + Pallas recon kernel).
    x_recon, sigmatrix = channel_decoder_forward(
        z, w0_T, w1_T, w2_T, w3_T, w4_T, use_pallas_recon=True)
    jax.block_until_ready((x_recon, sigmatrix))

    # 2) Hot path reusing the cached sigmatrix (single small matmul kernel).
    x_recon2, _ = channel_decoder_forward(
        z, w0_T, w1_T, w2_T, w3_T, w4_T, sigmatrix=sigmatrix,
        use_pallas_recon=True)
    jax.block_until_ready(x_recon2)

    assert x_recon.shape == (batch, output_dim) and x_recon.dtype == jnp.float32
    assert sigmatrix.shape == (input_dim, output_dim)
    assert bool(jnp.allclose(x_recon2, x_recon, atol=1e-6, rtol=1e-6))

    # ---- references (float64 on host) -------------------------------------
    def f64(a):
        return np.asarray(jax.device_get(a), dtype=np.float64)

    sig64 = np.maximum(
        f64(w0_T) @ f64(w1_T) @ f64(w2_T) @ f64(w3_T) @ f64(w4_T), 0.0)
    x64 = f64(z) @ sig64

    def rel_err(a, ref):
        a = np.asarray(jax.device_get(a), dtype=np.float64)
        return float(np.linalg.norm(a - ref) / (np.linalg.norm(ref) + 1e-30))

    # sigmatrix kernel is pure f32 -> faithful to the PyTorch f32 module.
    assert np.allclose(f64(sigmatrix), sig64, atol=2e-2, rtol=2e-2)
    assert rel_err(sigmatrix, sig64) < 2e-2

    # recon kernel: tight against a JAX mirror of the same bf16-in/f32-acc path,
    # and within bf16 input-rounding error of the exact f64 semantics.
    x_mirror = jnp.dot(z.astype(jnp.bfloat16), sigmatrix.astype(jnp.bfloat16),
                       preferred_element_type=jnp.float32)
    assert bool(jnp.allclose(x_recon, x_mirror, atol=5e-3, rtol=5e-3))
    assert rel_err(x_recon, x64) < 2e-2

    # 3) Small-batch auto-dispatch (fused-XLA fallback, same numerics).
    x_small, _ = channel_decoder_forward(
        z[:8], w0_T, w1_T, w2_T, w3_T, w4_T, sigmatrix=sigmatrix)
    jax.block_until_ready(x_small)
    assert x_small.shape == (8, output_dim)
    assert rel_err(x_small, x64[:8]) < 2e-2

    # 4) Optional bf16 output (halves writeback traffic on the hot path).
    x_bf16 = reconstruct(z, sigmatrix, out_dtype=jnp.bfloat16, use_pallas=True)
    jax.block_until_ready(x_bf16)
    assert x_bf16.dtype == jnp.bfloat16
    assert rel_err(x_bf16.astype(jnp.float32), x64) < 3e-2

    print("KERNEL_OK")
</pallas_src>

<mosaic_0001>
module attributes {stable_mosaic.version = 11 : i64} {
  func.func @_sigmatrix_kernel(%arg0: memref<16x64xf32, #tpu.memory_space<vmem>>, %arg1: memref<64x128xf32, #tpu.memory_space<vmem>>, %arg2: memref<128x256xf32, #tpu.memory_space<vmem>>, %arg3: memref<256x512xf32, #tpu.memory_space<vmem>>, %arg4: memref<512x256xf32, #tpu.memory_space<vmem>>, %arg5: memref<16x256xf32, #tpu.memory_space<vmem>>) attributes {dimension_semantics = [], scalar_prefetch = 0 : i64, scratch_operands = 0 : i64, tpu.core_type = #tpu.core_type<tc>} {
    %c0 = arith.constant 0 : index
    %c0_0 = arith.constant 0 : index
    %0 = vector.load %arg0[%c0, %c0_0] : memref<16x64xf32, #tpu.memory_space<vmem>>, vector<16x64xf32>
    %c0_1 = arith.constant 0 : index
    %c0_2 = arith.constant 0 : index
    %1 = vector.load %arg1[%c0_1, %c0_2] : memref<64x128xf32, #tpu.memory_space<vmem>>, vector<64x128xf32>
    %cst = arith.constant dense<0.000000e+00> : vector<16x128xf32>
    %2 = tpu.matmul %0, %1, %cst {dimension_numbers = #tpu.dot_dimension_numbers<[1], [0], [0], [1], [0, 0, 1, 1], [], []>} : vector<16x64xf32>, vector<64x128xf32>, vector<16x128xf32> -> vector<16x128xf32>
    %c0_3 = arith.constant 0 : index
    %c0_4 = arith.constant 0 : index
    %3 = vector.load %arg2[%c0_3, %c0_4] : memref<128x256xf32, #tpu.memory_space<vmem>>, vector<128x256xf32>
    %cst_5 = arith.constant dense<0.000000e+00> : vector<16x256xf32>
    %4 = tpu.matmul %2, %3, %cst_5 {dimension_numbers = #tpu.dot_dimension_numbers<[1], [0], [0], [1], [0, 0, 1, 1], [], []>} : vector<16x128xf32>, vector<128x256xf32>, vector<16x256xf32> -> vector<16x256xf32>
    %c0_6 = arith.constant 0 : index
    %c0_7 = arith.constant 0 : index
    %5 = vector.load %arg3[%c0_6, %c0_7] : memref<256x512xf32, #tpu.memory_space<vmem>>, vector<256x512xf32>
    %cst_8 = arith.constant dense<0.000000e+00> : vector<16x512xf32>
    %6 = tpu.matmul %4, %5, %cst_8 {dimension_numbers = #tpu.dot_dimension_numbers<[1], [0], [0], [1], [0, 0, 1, 1], [], []>} : vector<16x256xf32>, vector<256x512xf32>, vector<16x512xf32> -> vector<16x512xf32>
    %c0_9 = arith.constant 0 : index
    %c0_10 = arith.constant 0 : index
    %7 = vector.load %arg4[%c0_9, %c0_10] : memref<512x256xf32, #tpu.memory_space<vmem>>, vector<512x256xf32>
    %cst_11 = arith.constant dense<0.000000e+00> : vector<16x256xf32>
    %8 = tpu.matmul %6, %7, %cst_11 {dimension_numbers = #tpu.dot_dimension_numbers<[1], [0], [0], [1], [0, 0, 1, 1], [], []>} : vector<16x512xf32>, vector<512x256xf32>, vector<16x256xf32> -> vector<16x256xf32>
    %cst_12 = arith.constant 0.000000e+00 : f32
    %9 = vector.broadcast %cst_12 : f32 to vector<16x256xf32>
    %10 = arith.maximumf %8, %9 : vector<16x256xf32>
    %c0_13 = arith.constant 0 : index
    %c0_14 = arith.constant 0 : index
    %11 = vector.load %arg5[%c0_13, %c0_14] : memref<16x256xf32, #tpu.memory_space<vmem>>, vector<16x256xf32>
    tpu.vector_store %arg5[%c0_13, %c0_14], %10 {strides = array<i32>} : memref<16x256xf32, #tpu.memory_space<vmem>>, vector<16x256xf32>,
    return
  }
}

</mosaic_0001>

<bundles_post_ra>
// kernel: compute_sigmatrix.1
= control target key start
LH: loop header
LB: loop body
LE: loop exit
PB: predicated region body
PF: predicated region fallthrough
CT: control target
= control target key end

     0   :  { %10 = vsyncpa [#allocation3], 0  ;;  %s1127_s0 = inlined_call_operand.hbm [shape: f32[16,64], index: 0, kind: input, shape index: {}]   ;;  %s1128_s1 = inlined_call_operand.hbm [shape: f32[64,128], index: 1, kind: input, shape index: {}]   ;;  %s1129_s2 = inlined_call_operand.hbm [shape: f32[128,256], index: 2, kind: input, shape index: {}]   ;;  %s1130_s3 = inlined_call_operand.hbm [shape: f32[256,512], index: 3, kind: input, shape index: {}]   ;;  %s1131_s4 = inlined_call_operand.hbm [shape: f32[512,256], index: 4, kind: input, shape index: {}]   ;;  %s1132_s5 = inlined_call_operand.hbm [shape: f32[16,256], index: 5, kind: output, shape index: {}]  }
   0x1   :  { %11 = vsyncpa [#allocation6], 0 }
   0x2   :  { %12 = vsyncpa [#allocation9], 0 }
   0x3   :  { %13 = vsyncpa [#allocation4], 0  ;;  %s1053_s18 = smov [#allocation5]   ;;  %s1054_s20 = smov [#allocation8]  }
   0x4   :  { %s31_s19 = sshll.u32 %s1053_s18, 4  ;;  %s55_s21 = sshll.u32 %s1054_s20, 4  ;;  %s32_s19 = int_to_ptr.vmem [resolvable:$true] %s31_s19  ;;  %s56_s21 = int_to_ptr.vmem [resolvable:$true] %s55_s21 }
   0x5   :  { %s933_s22 = scalar_lea.vmem %s32_s19, 1024  ;;  %p938_p1 = scmp.lt.s32.totalorder %s32_s19, %s32_s19 }
   0x6   :  { %p934_p0 = scmp.ne.s32.totalorder %s32_s19, %s933_s22  ;;  %p939_p2 = scmp.lt.s32.totalorder %s933_s22, %s933_s22 }
   0x8   :  { %p940_p3 = por %p939_p2, %p938_p1 }
   0xa   :  { %p941_p4 = pnand %p940_p3, %p934_p0 }
   0xc   :  { %944 = shalt.err (!%p941_p4)
}
   0xd   :  { %s1055_s23 = smov 128   ;;  %s1056_s24 = smov 8  }
   0xe   :  { %37 = dma.hbm_to_vmem [thread:$0]  %s1128_s1, 1024, %s32_s19, [#allocation6], %s1055_s23, %s1055_s23, %s1056_s24  }
   0xf   :  { %s953_s27 = scalar_lea.vmem %s56_s21, 16384  ;;  %p958_p6 = scmp.lt.s32.totalorder %s56_s21, %s56_s21 }
  0x10   :  { %p954_p5 = scmp.ne.s32.totalorder %s56_s21, %s953_s27  ;;  %p959_p7 = scmp.lt.s32.totalorder %s953_s27, %s953_s27 }
  0x12   :  { %p960_p8 = por %p959_p7, %p958_p6 }
  0x14   :  { %p961_p9 = pnand %p960_p8, %p954_p5 }
  0x16   :  { %964 = shalt.err (!%p961_p9)
}
  0x17   :  { %s1057_s28 = smov 512   ;;  %s1058_s29 = smov 32  }
  0x18   :  { %61 = dma.hbm_to_vmem [thread:$0]  %s1130_s3, 16384, %s56_s21, [#allocation9], %s1057_s28, %s1057_s28, %s1058_s29  }
  0x19   :  { %s1059_s7 = smov [#allocation2]   ;;  %s1060_s9 = smov [#allocation7]  }
  0x1a   :  { %s19_s8 = sshll.u32 %s1059_s7, 4  ;;  %s43_s10 = sshll.u32 %s1060_s9, 4  ;;  %s20_s8 = int_to_ptr.vmem [resolvable:$true] %s19_s8  ;;  %s44_s10 = int_to_ptr.vmem [resolvable:$true] %s43_s10 }
  0x1b   :  { %s973_s1 = scalar_lea.vmem %s20_s8, 256  ;;  %p978_p11 = scmp.lt.s32.totalorder %s20_s8, %s20_s8 }
  0x1c   :  { %p974_p10 = scmp.ne.s32.totalorder %s20_s8, %s973_s1  ;;  %p979_p12 = scmp.lt.s32.totalorder %s973_s1, %s973_s1 }
  0x1e   :  { %p980_p13 = por %p979_p12, %p978_p11 }
  0x20   :  { %p981_p0 = pnand %p980_p13, %p974_p10 }
  0x22   :  { %984 = shalt.err (!%p981_p0)
}
  0x23   :  { %25 = dma.hbm_to_vmem [thread:$0]  %s1127_s0, 256, %s20_s8, [#allocation3], %s1055_s23, %s1055_s23, %s1056_s24  }
  0x24   :  { %s993_s13 = scalar_lea.vmem %s44_s10, 4096  ;;  %p998_p2 = scmp.lt.s32.totalorder %s44_s10, %s44_s10 }
  0x25   :  { %p994_p1 = scmp.ne.s32.totalorder %s44_s10, %s993_s13  ;;  %p999_p3 = scmp.lt.s32.totalorder %s993_s13, %s993_s13 }
  0x27   :  { %p1000_p4 = por %p999_p3, %p998_p2 }
  0x29   :  { %p1001_p5 = pnand %p1000_p4, %p994_p1 }
  0x2b   :  { %1004 = shalt.err (!%p1001_p5)
}
  0x2c   :  { %s1061_s3 = smov 256   ;;  %s1062_s14 = smov 16  }
  0x2d   :  { %49 = dma.hbm_to_vmem [thread:$0]  %s1129_s2, 4096, %s44_s10, [#allocation6], %s1061_s3, %s1061_s3, %s1062_s14  }
  0x2e   :  { %s1063_s17 = smov [#allocation10]  }
  0x2f   :  { %s67_s18 = sshll.u32 %s1063_s17, 4  ;;  %s68_s18 = int_to_ptr.vmem [resolvable:$true] %s67_s18 }
  0x30   :  { %s1013_s0 = scalar_lea.vmem %s68_s18, 16384  ;;  %p1018_p7 = scmp.lt.s32.totalorder %s68_s18, %s68_s18 }
  0x31   :  { %p1014_p6 = scmp.ne.s32.totalorder %s68_s18, %s1013_s0  ;;  %p1019_p8 = scmp.lt.s32.totalorder %s1013_s0, %s1013_s0 }
  0x33   :  { %p1020_p9 = por %p1019_p8, %p1018_p7 }
  0x35   :  { %p1021_p10 = pnand %p1020_p9, %p1014_p6 }
  0x37   :  { %1024 = shalt.err (!%p1021_p10)
}
  0x38   :  { %73 = dma.hbm_to_vmem [thread:$0]  %s1131_s4, 16384, %s68_s18, [#allocation9], %s1061_s3, %s1061_s3, %s1062_s14  }
  0x39   :  { %1045 = dma.done.wait [#allocation3], 256  }
  0x3a   :  { %1046 = vsyncadd [#allocation3], 4294967040 }
  0x3b   :  { %1047 = dma.done.wait [#allocation6], 5120  }
  0x3c   :  { %1048 = vsyncadd [#allocation6], 4294962176 }
  0x3d   :  { %1049 = dma.done.wait [#allocation9], 32768  }
  0x3e   :  { %1050 = vsyncadd [#allocation9], 4294934528  ;;  %v98_v0 = vld [vmem:[#allocation5 + $0x38] sm:$0xff]  ;;  %v97_v1 = vld [vmem:[#allocation5 + $0x30] sm:$0xff]  ;;  %vm99_vm0 = vcmask 523264   ;;  %v1064_v42 = vmov 0.0  }
  0x3f   :  { %893 = vmatprep.subr.mxu0 %v98_v0  ;;  %v96_v2 = vld [vmem:[#allocation5 + $0x28] sm:$0xff]  ;;  %v89_v3 = vld [vmem:[#allocation2] sm:$0xff]  ;;  %v212_v4 = vld [vmem:[#allocation7 + $0xf8] sm:$0xff]  ;;  %277 = vmatprep.mubr.f32.mxu1 %v1064_v42  ;;  %s1065_s2 = smov [#allocation11]  }
  0x40   :  { %894 = vmatpush3.msra.mxu0 %v98_v0  ;;  %909 = vmatprep.mubr.msk.f32.mxu0 %vm99_vm0, %v89_v3  ;;  %v211_v5 = vld [vmem:[#allocation7 + $0xf0] sm:$0xff]  ;;  %v95_v6 = vld [vmem:[#allocation5 + $0x20] sm:$0xff]  ;;  %v210_v7 = vld [vmem:[#allocation7 + $0xe8] sm:$0xff]  ;;  %s867_s4 = sshll.u32 %s1065_s2, 4  ;;  %s868_s4 = int_to_ptr.vmem [resolvable:$true] %s867_s4 }
  0x41   :  { %895 = vmatprep.subr.mxu0 %v97_v1  ;;  %213 = vmatprep.subr.mxu1 %v212_v4  ;;  %v209_v8 = vld [vmem:[#allocation7 + $0xe0] sm:$0xff]  ;;  %v208_v9 = vld [vmem:[#allocation7 + $0xd8] sm:$0xff]  ;;  %v207_v11 = vld [vmem:[#allocation7 + $0xd0] sm:$0xff]  ;;  %s1025_s21 = scalar_lea.vmem %s868_s4, 512  ;;  %p1030_p12 = scmp.lt.s32.totalorder %s868_s4, %s868_s4 }
  0x42   :  { %896 = vmatpush3.msra.mxu0 %v97_v1  ;;  %214 = vmatpush1.msra.mxu1 %v211_v5  ;;  %v94_v10 = vld [vmem:[#allocation5 + $0x18] sm:$0xff]  ;;  %v206_v12 = vld [vmem:[#allocation7 + $0xc8] sm:$0xff]  ;;  %v93_v13 = vld [vmem:[#allocation5 + $0x10] sm:$0xff]  ;;  %p1026_p11 = scmp.ne.s32.totalorder %s868_s4, %s1025_s21  ;;  %p1031_p13 = scmp.lt.s32.totalorder %s1025_s21, %s1025_s21 }
  0x43   :  { %897 = vmatprep.subr.mxu0 %v96_v2  ;;  %215 = vmatprep.subr.mxu1 %v210_v7  ;;  %v205_v14 = vld [vmem:[#allocation7 + $0xc0] sm:$0xff]  ;;  %v204_v15 = vld [vmem:[#allocation7 + $0xb8] sm:$0xff]  ;;  %v92_v16 = vld [vmem:[#allocation5 + $0x8] sm:$0xff] }
  0x44   :  { %898 = vmatpush3.msra.mxu0 %v96_v2  ;;  %216 = vmatpush1.msra.mxu1 %v209_v8  ;;  %v203_v17 = vld [vmem:[#allocation7 + $0xb0] sm:$0xff]  ;;  %v202_v18 = vld [vmem:[#allocation7 + $0xa8] sm:$0xff]  ;;  %v91_v19 = vld [vmem:[#allocation5] sm:$0xff]  ;;  %p1032_p0 = por %p1031_p13, %p1030_p12 }
  0x45   :  { %899 = vmatprep.subr.mxu0 %v95_v6  ;;  %217 = vmatprep.subr.mxu1 %v208_v9  ;;  %v201_v20 = vld [vmem:[#allocation7 + $0xa0] sm:$0xff]  ;;  %v200_v21 = vld [vmem:[#allocation7 + $0x98] sm:$0xff]  ;;  %v199_v23 = vld [vmem:[#allocation7 + $0x90] sm:$0xff] }
  0x46   :  { %900 = vmatpush3.msra.mxu0 %v95_v6  ;;  %218 = vmatpush1.msra.mxu1 %v207_v11  ;;  %v90_v22 = vld [vmem:[#allocation2 + $0x8] sm:$0xff]  ;;  %v198_v24 = vld [vmem:[#allocation7 + $0x88] sm:$0xff]  ;;  %v197_v25 = vld [vmem:[#allocation7 + $0x80] sm:$0xff]  ;;  %p1033_p1 = pnand %p1032_p0, %p1026_p11 }
  0x47   :  { %901 = vmatprep.subr.mxu0 %v94_v10  ;;  %219 = vmatprep.subr.mxu1 %v206_v12  ;;  %v196_v26 = vld [vmem:[#allocation7 + $0x78] sm:$0xff]  ;;  %v195_v27 = vld [vmem:[#allocation7 + $0x70] sm:$0xff]  ;;  %v194_v28 = vld [vmem:[#allocation7 + $0x68] sm:$0xff] }
  0x48   :  { %902 = vmatpush3.msra.mxu0 %v94_v10  ;;  %220 = vmatpush1.msra.mxu1 %v205_v14  ;;  %v193_v29 = vld [vmem:[#allocation7 + $0x60] sm:$0xff]  ;;  %v192_v30 = vld [vmem:[#allocation7 + $0x58] sm:$0xff]  ;;  %v191_v31 = vld [vmem:[#allocation7 + $0x50] sm:$0xff] }
  0x49   :  { %903 = vmatprep.subr.mxu0 %v93_v13  ;;  %221 = vmatprep.subr.mxu1 %v204_v15  ;;  %v190_v32 = vld [vmem:[#allocation7 + $0x48] sm:$0xff]  ;;  %v189_v33 = vld [vmem:[#allocation7 + $0x40] sm:$0xff]  ;;  %v188_v34 = vld [vmem:[#allocation7 + $0x38] sm:$0xff] }
  0x4a   :  { %904 = vmatpush3.msra.mxu0 %v93_v13  ;;  %222 = vmatpush1.msra.mxu1 %v203_v17  ;;  %v187_v35 = vld [vmem:[#allocation7 + $0x30] sm:$0xff]  ;;  %v186_v36 = vld [vmem:[#allocation7 + $0x28] sm:$0xff]  ;;  %v185_v37 = vld [vmem:[#allocation7 + $0x20] sm:$0xff] }
  0x4b   :  { %905 = vmatprep.subr.mxu0 %v92_v16  ;;  %223 = vmatprep.subr.mxu1 %v202_v18  ;;  %v184_v38 = vld [vmem:[#allocation7 + $0x18] sm:$0xff]  ;;  %v183_v39 = vld [vmem:[#allocation7 + $0x10] sm:$0xff]  ;;  %v182_v40 = vld [vmem:[#allocation7 + $0x8] sm:$0xff] }
  0x4c   :  { %906 = vmatpush3.msra.mxu0 %v92_v16  ;;  %224 = vmatpush1.msra.mxu1 %v201_v20  ;;  %v181_v41 = vld [vmem:[#allocation7] sm:$0xff]  ;;  %v351_v43 = vld [vmem:[#allocation8 + $0x1e8] sm:$0xff]  ;;  %v353_v44 = vld [vmem:[#allocation8 + $0x1f8] sm:$0xff] }
  0x4d   :  { %907 = vmatprep.subr.mxu0 %v91_v19  ;;  %225 = vmatprep.subr.mxu1 %v200_v21  ;;  %v350_v45 = vld [vmem:[#allocation8 + $0x1e0] sm:$0xff]  ;;  %v347_v46 = vld [vmem:[#allocation8 + $0x1c8] sm:$0xff] }
  0x4e   :  { %908 = vmatpush3.msra.mxu0 %v91_v19  ;;  %226 = vmatpush1.msra.mxu1 %v199_v23  ;;  %v346_v47 = vld [vmem:[#allocation8 + $0x1c0] sm:$0xff]  ;;  %v343_v48 = vld [vmem:[#allocation8 + $0x1a8] sm:$0xff] }
  0x4f   :  { %910 = vmatmul.mubr.msk.f32.vlgmr.msra.gmra.mxu0 %vm99_vm0, %v90_v22  ;;  %227 = vmatprep.subr.mxu1 %v198_v24  ;;  %v342_v49 = vld [vmem:[#allocation8 + $0x1a0] sm:$0xff]  ;;  %v339_v50 = vld [vmem:[#allocation8 + $0x188] sm:$0xff] }
  0x50   :  { %228 = vmatpush1.msra.mxu1 %v197_v25  ;;  %418 = vmatprep.subr.mxu0 %v351_v43  ;;  %v338_v51 = vld [vmem:[#allocation8 + $0x180] sm:$0xff]  ;;  %v335_v52 = vld [vmem:[#allocation8 + $0x168] sm:$0xff] }
  0x51   :  { %229 = vmatprep.subr.mxu1 %v196_v26  ;;  %419 = vmatpush1.msra.mxu0 %v350_v45  ;;  %v334_v53 = vld [vmem:[#allocation8 + $0x160] sm:$0xff]  ;;  %v331_v54 = vld [vmem:[#allocation8 + $0x148] sm:$0xff]  ;;  %v348_v45 = vld [vmem:[#allocation8 + $0x1d0] sm:$0xff] }
  0x52   :  { %230 = vmatpush1.msra.mxu1 %v195_v27  ;;  %420 = vmatprep.subr.mxu0 %v347_v46  ;;  %v330_v55 = vld [vmem:[#allocation8 + $0x140] sm:$0xff]  ;;  %v327_v56 = vld [vmem:[#allocation8 + $0x128] sm:$0xff]  ;;  %v345_v46 = vld [vmem:[#allocation8 + $0x1b8] sm:$0xff] }
  0x53   :  { %231 = vmatprep.subr.mxu1 %v194_v28  ;;  %421 = vmatpush1.msra.mxu0 %v346_v47  ;;  %v326_v57 = vld [vmem:[#allocation8 + $0x120] sm:$0xff]  ;;  %v323_v58 = vld [vmem:[#allocation8 + $0x108] sm:$0xff]  ;;  %v344_v47 = vld [vmem:[#allocation8 + $0x1b0] sm:$0xff] }
  0x54   :  { %232 = vmatpush1.msra.mxu1 %v193_v29  ;;  %422 = vmatprep.subr.mxu0 %v343_v48  ;;  %v322_v59 = vld [vmem:[#allocation8 + $0x100] sm:$0xff]  ;;  %v319_v60 = vld [vmem:[#allocation8 + $0xe8] sm:$0xff]  ;;  %v341_v48 = vld [vmem:[#allocation8 + $0x198] sm:$0xff] }
  0x55   :  { %233 = vmatprep.subr.mxu1 %v192_v30  ;;  %423 = vmatpush1.msra.mxu0 %v342_v49  ;;  %v318_v61 = vld [vmem:[#allocation8 + $0xe0] sm:$0xff]  ;;  %v315_v62 = vld [vmem:[#allocation8 + $0xc8] sm:$0xff]  ;;  %v340_v49 = vld [vmem:[#allocation8 + $0x190] sm:$0xff] }
  0x56   :  { %234 = vmatpush1.msra.mxu1 %v191_v31  ;;  %424 = vmatprep.subr.mxu0 %v339_v50  ;;  %v314_v63 = vld [vmem:[#allocation8 + $0xc0] sm:$0xff]  ;;  %v311_v0 = vld [vmem:[#allocation8 + $0xa8] sm:$0xff]  ;;  %v337_v50 = vld [vmem:[#allocation8 + $0x178] sm:$0xff] }
  0x57   :  { %235 = vmatprep.subr.mxu1 %v190_v32  ;;  %425 = vmatpush1.msra.mxu0 %v338_v51  ;;  %v310_v1 = vld [vmem:[#allocation8 + $0xa0] sm:$0xff]  ;;  %v307_v2 = vld [vmem:[#allocation8 + $0x88] sm:$0xff]  ;;  %v336_v51 = vld [vmem:[#allocation8 + $0x170] sm:$0xff] }
  0x58   :  { %236 = vmatpush1.msra.mxu1 %v189_v33  ;;  %426 = vmatprep.subr.mxu0 %v335_v52  ;;  %v306_v3 = vld [vmem:[#allocation8 + $0x80] sm:$0xff]  ;;  %v303_v4 = vld [vmem:[#allocation8 + $0x68] sm:$0xff]  ;;  %v333_v52 = vld [vmem:[#allocation8 + $0x158] sm:$0xff] }
  0x59   :  { %237 = vmatprep.subr.mxu1 %v188_v34  ;;  %427 = vmatpush1.msra.mxu0 %v334_v53  ;;  %v302_v5 = vld [vmem:[#allocation8 + $0x60] sm:$0xff]  ;;  %v299_v6 = vld [vmem:[#allocation8 + $0x48] sm:$0xff]  ;;  %v332_v53 = vld [vmem:[#allocation8 + $0x150] sm:$0xff] }
  0x5a   :  { %238 = vmatpush1.msra.mxu1 %v187_v35  ;;  %428 = vmatprep.subr.mxu0 %v331_v54  ;;  %v298_v7 = vld [vmem:[#allocation8 + $0x40] sm:$0xff]  ;;  %v295_v8 = vld [vmem:[#allocation8 + $0x28] sm:$0xff]  ;;  %v329_v54 = vld [vmem:[#allocation8 + $0x138] sm:$0xff] }
  0x5b   :  { %239 = vmatprep.subr.mxu1 %v186_v36  ;;  %429 = vmatpush1.msra.mxu0 %v330_v55  ;;  %v294_v9 = vld [vmem:[#allocation8 + $0x20] sm:$0xff]  ;;  %v291_v10 = vld [vmem:[#allocation8 + $0x8] sm:$0xff]  ;;  %v325_v55 = vld [vmem:[#allocation8 + $0x118] sm:$0xff] }
  0x5c   :  { %240 = vmatpush1.msra.mxu1 %v185_v37  ;;  %430 = vmatprep.subr.mxu0 %v327_v56  ;;  %v290_v11 = vld [vmem:[#allocation8] sm:$0xff]  ;;  %v415_v12 = vld [vmem:[#allocation8 + $0x3e8] sm:$0xff]  ;;  %v324_v56 = vld [vmem:[#allocation8 + $0x110] sm:$0xff] }
  0x5d   :  { %241 = vmatprep.subr.mxu1 %v184_v38  ;;  %431 = vmatpush1.msra.mxu0 %v326_v57  ;;  %v414_v13 = vld [vmem:[#allocation8 + $0x3e0] sm:$0xff]  ;;  %v411_v14 = vld [vmem:[#allocation8 + $0x3c8] sm:$0xff]  ;;  %v321_v57 = vld [vmem:[#allocation8 + $0xf8] sm:$0xff] }
  0x5e   :  { %242 = vmatpush1.msra.mxu1 %v183_v39  ;;  %432 = vmatprep.subr.mxu0 %v323_v58  ;;  %v410_v15 = vld [vmem:[#allocation8 + $0x3c0] sm:$0xff]  ;;  %v407_v16 = vld [vmem:[#allocation8 + $0x3a8] sm:$0xff]  ;;  %v320_v58 = vld [vmem:[#allocation8 + $0xf0] sm:$0xff] }
  0x5f   :  { %243 = vmatprep.subr.mxu1 %v182_v40  ;;  %433 = vmatpush1.msra.mxu0 %v322_v59  ;;  %v406_v17 = vld [vmem:[#allocation8 + $0x3a0] sm:$0xff]  ;;  %v403_v18 = vld [vmem:[#allocation8 + $0x388] sm:$0xff]  ;;  %v317_v59 = vld [vmem:[#allocation8 + $0xd8] sm:$0xff] }
  0x60   :  { %244 = vmatpush1.msra.mxu1 %v181_v41  ;;  %434 = vmatprep.subr.mxu0 %v319_v60  ;;  %v402_v19 = vld [vmem:[#allocation8 + $0x380] sm:$0xff]  ;;  %v399_v20 = vld [vmem:[#allocation8 + $0x368] sm:$0xff]  ;;  %v352_v41 = vld [vmem:[#allocation8 + $0x1f0] sm:$0xff] }
  0x61   :  { %495 = vmatprep.subr.mxu1 %v353_v44  ;;  %435 = vmatpush1.msra.mxu0 %v318_v61  ;;  %v398_v21 = vld [vmem:[#allocation8 + $0x360] sm:$0xff]  ;;  %v395_v22 = vld [vmem:[#allocation8 + $0x348] sm:$0xff]  ;;  %v349_v44 = vld [vmem:[#allocation8 + $0x1d8] sm:$0xff] }
  0x62   :  { %436 = vmatprep.subr.mxu0 %v315_v62  ;;  %v394_v23 = vld [vmem:[#allocation8 + $0x340] sm:$0xff]  ;;  %v391_v24 = vld [vmem:[#allocation8 + $0x328] sm:$0xff]  ;;  %v316_v60 = vld [vmem:[#allocation8 + $0xd0] sm:$0xff] }
  0x63   :  { %437 = vmatpush1.msra.mxu0 %v314_v63  ;;  %v390_v25 = vld [vmem:[#allocation8 + $0x320] sm:$0xff]  ;;  %v387_v26 = vld [vmem:[#allocation8 + $0x308] sm:$0xff]  ;;  %v313_v61 = vld [vmem:[#allocation8 + $0xb8] sm:$0xff] }
  0x64   :  { %438 = vmatprep.subr.mxu0 %v311_v0  ;;  %v386_v27 = vld [vmem:[#allocation8 + $0x300] sm:$0xff]  ;;  %v383_v28 = vld [vmem:[#allocation8 + $0x2e8] sm:$0xff]  ;;  %v312_v62 = vld [vmem:[#allocation8 + $0xb0] sm:$0xff] }
  0x65   :  { %439 = vmatpush1.msra.mxu0 %v310_v1  ;;  %v382_v29 = vld [vmem:[#allocation8 + $0x2e0] sm:$0xff]  ;;  %v379_v30 = vld [vmem:[#allocation8 + $0x2c8] sm:$0xff]  ;;  %v309_v63 = vld [vmem:[#allocation8 + $0x98] sm:$0xff] }
  0x66   :  { %440 = vmatprep.subr.mxu0 %v307_v2  ;;  %v378_v31 = vld [vmem:[#allocation8 + $0x2c0] sm:$0xff]  ;;  %v375_v32 = vld [vmem:[#allocation8 + $0x2a8] sm:$0xff]  ;;  %v308_v0 = vld [vmem:[#allocation8 + $0x90] sm:$0xff] }
  0x67   :  { %441 = vmatpush1.msra.mxu0 %v306_v3  ;;  %v374_v33 = vld [vmem:[#allocation8 + $0x2a0] sm:$0xff]  ;;  %v371_v34 = vld [vmem:[#allocation8 + $0x288] sm:$0xff]  ;;  %v305_v1 = vld [vmem:[#allocation8 + $0x78] sm:$0xff] }
  0x68   :  { %442 = vmatprep.subr.mxu0 %v303_v4  ;;  %v370_v35 = vld [vmem:[#allocation8 + $0x280] sm:$0xff]  ;;  %v367_v36 = vld [vmem:[#allocation8 + $0x268] sm:$0xff]  ;;  %v304_v2 = vld [vmem:[#allocation8 + $0x70] sm:$0xff] }
  0x69   :  { %443 = vmatpush1.msra.mxu0 %v302_v5  ;;  %v366_v37 = vld [vmem:[#allocation8 + $0x260] sm:$0xff]  ;;  %v363_v38 = vld [vmem:[#allocation8 + $0x248] sm:$0xff]  ;;  %v301_v3 = vld [vmem:[#allocation8 + $0x58] sm:$0xff] }
  0x6a   :  { %444 = vmatprep.subr.mxu0 %v299_v6  ;;  %v362_v39 = vld [vmem:[#allocation8 + $0x240] sm:$0xff]  ;;  %v300_v4 = vld [vmem:[#allocation8 + $0x50] sm:$0xff]  ;;  %v297_v5 = vld [vmem:[#allocation8 + $0x38] sm:$0xff] }
  0x6b   :  { %445 = vmatpush1.msra.mxu0 %v298_v7  ;;  %v296_v6 = vld [vmem:[#allocation8 + $0x30] sm:$0xff]  ;;  %v293_v7 = vld [vmem:[#allocation8 + $0x18] sm:$0xff] }
  0x6c   :  { %446 = vmatprep.subr.mxu0 %v295_v8  ;;  %v292_v8 = vld [vmem:[#allocation8 + $0x10] sm:$0xff] }
  0x6d   :  { %447 = vmatpush1.msra.mxu0 %v294_v9  ;;  %v417_v9 = vld [vmem:[#allocation8 + $0x3f8] sm:$0xff] }
  0x6e   :  { %448 = vmatprep.subr.mxu0 %v291_v10  ;;  %v416_v10 = vld [vmem:[#allocation8 + $0x3f0] sm:$0xff] }
  0x6f   :  { %449 = vmatpush1.msra.mxu0 %v290_v11  ;;  %v413_v11 = vld [vmem:[#allocation8 + $0x3d8] sm:$0xff] }
  0x70   :  { %450 = vmatprep.subr.mxu0 %v415_v12  ;;  %v412_v12 = vld [vmem:[#allocation8 + $0x3d0] sm:$0xff] }
  0x71   :  { %451 = vmatpush2.msra.mxu0 %v414_v13  ;;  %v409_v13 = vld [vmem:[#allocation8 + $0x3b8] sm:$0xff] }
  0x72   :  { %452 = vmatprep.subr.mxu0 %v411_v14  ;;  %v408_v14 = vld [vmem:[#allocation8 + $0x3b0] sm:$0xff] }
  0x73   :  { %453 = vmatpush2.msra.mxu0 %v410_v15  ;;  %v405_v15 = vld [vmem:[#allocation8 + $0x398] sm:$0xff] }
  0x74   :  { %454 = vmatprep.subr.mxu0 %v407_v16  ;;  %v404_v16 = vld [vmem:[#allocation8 + $0x390] sm:$0xff] }
  0x75   :  { %455 = vmatpush2.msra.mxu0 %v406_v17  ;;  %v401_v17 = vld [vmem:[#allocation8 + $0x378] sm:$0xff] }
  0x76   :  { %456 = vmatprep.subr.mxu0 %v403_v18  ;;  %v400_v18 = vld [vmem:[#allocation8 + $0x370] sm:$0xff] }
  0x77   :  { %457 = vmatpush2.msra.mxu0 %v402_v19  ;;  %v397_v19 = vld [vmem:[#allocation8 + $0x358] sm:$0xff] }
  0x78   :  { %458 = vmatprep.subr.mxu0 %v399_v20  ;;  %v396_v20 = vld [vmem:[#allocation8 + $0x350] sm:$0xff] }
  0x79   :  { %459 = vmatpush2.msra.mxu0 %v398_v21  ;;  %v393_v21 = vld [vmem:[#allocation8 + $0x338] sm:$0xff] }
  0x7a   :  { %460 = vmatprep.subr.mxu0 %v395_v22  ;;  %v392_v22 = vld [vmem:[#allocation8 + $0x330] sm:$0xff] }
  0x7b   :  { %461 = vmatpush2.msra.mxu0 %v394_v23  ;;  %v389_v23 = vld [vmem:[#allocation8 + $0x318] sm:$0xff] }
  0x7c   :  { %462 = vmatprep.subr.mxu0 %v391_v24  ;;  %v388_v24 = vld [vmem:[#allocation8 + $0x310] sm:$0xff] }
  0x7d   :  { %463 = vmatpush2.msra.mxu0 %v390_v25  ;;  %v385_v25 = vld [vmem:[#allocation8 + $0x2f8] sm:$0xff] }
  0x7e   :  { %464 = vmatprep.subr.mxu0 %v387_v26  ;;  %v384_v26 = vld [vmem:[#allocation8 + $0x2f0] sm:$0xff] }
  0x7f   :  { %465 = vmatpush2.msra.mxu0 %v386_v27  ;;  %v381_v27 = vld [vmem:[#allocation8 + $0x2d8] sm:$0xff] }
  0x80   :  { %466 = vmatprep.subr.mxu0 %v383_v28  ;;  %v380_v28 = vld [vmem:[#allocation8 + $0x2d0] sm:$0xff] }
  0x81   :  { %467 = vmatpush2.msra.mxu0 %v382_v29  ;;  %v377_v29 = vld [vmem:[#allocation8 + $0x2b8] sm:$0xff] }
  0x82   :  { %468 = vmatprep.subr.mxu0 %v379_v30  ;;  %v376_v30 = vld [vmem:[#allocation8 + $0x2b0] sm:$0xff] }
  0x83   :  { %469 = vmatpush2.msra.mxu0 %v378_v31  ;;  %v373_v31 = vld [vmem:[#allocation8 + $0x298] sm:$0xff] }
  0x84   :  { %470 = vmatprep.subr.mxu0 %v375_v32  ;;  %v372_v32 = vld [vmem:[#allocation8 + $0x290] sm:$0xff] }
  0x85   :  { %471 = vmatpush2.msra.mxu0 %v374_v33  ;;  %v369_v33 = vld [vmem:[#allocation8 + $0x278] sm:$0xff] }
  0x86   :  { %472 = vmatprep.subr.mxu0 %v371_v34  ;;  %v368_v34 = vld [vmem:[#allocation8 + $0x270] sm:$0xff] }
  0x87   :  { %473 = vmatpush2.msra.mxu0 %v370_v35  ;;  %v365_v35 = vld [vmem:[#allocation8 + $0x258] sm:$0xff] }
  0x88   :  { %474 = vmatprep.subr.mxu0 %v367_v36  ;;  %v364_v36 = vld [vmem:[#allocation8 + $0x250] sm:$0xff] }
  0x89   :  { %475 = vmatpush2.msra.mxu0 %v366_v37  ;;  %v359_v37 = vld [vmem:[#allocation8 + $0x228] sm:$0xff] }
  0x8a   :  { %476 = vmatprep.subr.mxu0 %v363_v38  ;;  %v361_v38 = vld [vmem:[#allocation8 + $0x238] sm:$0xff] }
  0x8b   :  { %477 = vmatpush2.msra.mxu0 %v362_v39  ;;  %v358_v39 = vld [vmem:[#allocation8 + $0x220] sm:$0xff] }
  0x8c   :  { %478 = vmatprep.subr.mxu0 %v359_v37  ;;  %v577_v37 = vld [vmem:[#allocation10 + $0x28] sm:$0xff] }
  0x8d   :  { %479 = vmatpush2.msra.mxu0 %v358_v39  ;;  %v576_v39 = vld [vmem:[#allocation10 + $0x20] sm:$0xff] }
 0x10f   :  { %v911_v40 = vpop.f32.mrf.mxu0 }
 0x111   :  { %v172_v43 = vpop.f32.mrf.mxu0 }
 0x112   :  { %278 = vmatmul.mubr.f32.vlgmr.msra.gmra.mxu1 %v172_v43  ;;  %v357_v43 = vld [vmem:[#allocation8 + $0x218] sm:$0xff] }
 0x113   :  { %283 = vmatprep.mubr.f32.mxu1 %v1064_v42  ;;  %496 = vmatpush1.msra.mxu1 %v352_v41  ;;  %v328_v42 = vld [vmem:[#allocation8 + $0x130] sm:$0xff]  ;;  %v355_v41 = vld [vmem:[#allocation8 + $0x208] sm:$0xff] }
 0x114   :  { %497 = vmatprep.subr.mxu1 %v349_v44  ;;  %480 = vmatprep.subr.mxu0 %v355_v41  ;;  %v354_v44 = vld [vmem:[#allocation8 + $0x200] sm:$0xff]  ;;  %v575_v41 = vld [vmem:[#allocation10 + $0x18] sm:$0xff] }
 0x115   :  { %498 = vmatpush1.msra.mxu1 %v348_v45  ;;  %v356_v45 = vld [vmem:[#allocation8 + $0x210] sm:$0xff]  ;;  %481 = vmatpush2.msra.mxu0 %v354_v44 }
 0x116   :  { %284 = vmatmul.mubr.f32.gmra.mxu1 %v911_v40  ;;  %499 = vmatprep.subr.mxu1 %v345_v46  ;;  %v360_v40 = vld [vmem:[#allocation8 + $0x230] sm:$0xff]  ;;  %v603_v46 = vld [vmem:[#allocation10 + $0xf8] sm:$0xff] }
 0x117   :  { %500 = vmatpush1.msra.mxu1 %v344_v47  ;;  %v667_v47 = vld [vmem:[#allocation10 + $0x2f8] sm:$0xff]  ;;  %700 = vmatprep.subr.mxu0 %v603_v46  ;;  %v574_v44 = vld [vmem:[#allocation10 + $0x10] sm:$0xff]  ;;  %v573_v46 = vld [vmem:[#allocation10 + $0x8] sm:$0xff] }
 0x118   :  { %501 = vmatprep.subr.mxu1 %v341_v48 }
 0x119   :  { %502 = vmatpush1.msra.mxu1 %v340_v49 }
 0x11a   :  { %503 = vmatprep.subr.mxu1 %v337_v50  ;;  %v602_v50 = vld [vmem:[#allocation10 + $0xf0] sm:$0xff] }
 0x11b   :  { %504 = vmatpush1.msra.mxu1 %v336_v51  ;;  %v666_v51 = vld [vmem:[#allocation10 + $0x2f0] sm:$0xff] }
 0x11c   :  { %505 = vmatprep.subr.mxu1 %v333_v52  ;;  %v601_v52 = vld [vmem:[#allocation10 + $0xe8] sm:$0xff] }
 0x11d   :  { %506 = vmatpush1.msra.mxu1 %v332_v53  ;;  %v665_v53 = vld [vmem:[#allocation10 + $0x2e8] sm:$0xff] }
 0x11e   :  { %507 = vmatprep.subr.mxu1 %v329_v54 }
 0x11f   :  { %508 = vmatpush1.msra.mxu1 %v328_v42 }
 0x120   :  { %509 = vmatprep.subr.mxu1 %v325_v55  ;;  %v600_v55 = vld [vmem:[#allocation10 + $0xe0] sm:$0xff] }
 0x121   :  { %510 = vmatpush1.msra.mxu1 %v324_v56  ;;  %v664_v56 = vld [vmem:[#allocation10 + $0x2e0] sm:$0xff] }
 0x122   :  { %511 = vmatprep.subr.mxu1 %v321_v57  ;;  %v599_v57 = vld [vmem:[#allocation10 + $0xd8] sm:$0xff] }
 0x123   :  { %512 = vmatpush1.msra.mxu1 %v320_v58  ;;  %v663_v58 = vld [vmem:[#allocation10 + $0x2d8] sm:$0xff] }
 0x124   :  { %513 = vmatprep.subr.mxu1 %v317_v59  ;;  %v598_v59 = vld [vmem:[#allocation10 + $0xd0] sm:$0xff] }
 0x125   :  { %514 = vmatpush1.msra.mxu1 %v316_v60  ;;  %v662_v60 = vld [vmem:[#allocation10 + $0x2d0] sm:$0xff] }
 0x126   :  { %515 = vmatprep.subr.mxu1 %v313_v61  ;;  %v597_v61 = vld [vmem:[#allocation10 + $0xc8] sm:$0xff] }
 0x127   :  { %516 = vmatpush1.msra.mxu1 %v312_v62  ;;  %v661_v62 = vld [vmem:[#allocation10 + $0x2c8] sm:$0xff] }
 0x128   :  { %517 = vmatprep.subr.mxu1 %v309_v63  ;;  %v596_v63 = vld [vmem:[#allocation10 + $0xc0] sm:$0xff] }
 0x129   :  { %518 = vmatpush1.msra.mxu1 %v308_v0  ;;  %v660_v0 = vld [vmem:[#allocation10 + $0x2c0] sm:$0xff] }
 0x12a   :  { %519 = vmatprep.subr.mxu1 %v305_v1  ;;  %v595_v1 = vld [vmem:[#allocation10 + $0xb8] sm:$0xff] }
 0x12b   :  { %520 = vmatpush1.msra.mxu1 %v304_v2  ;;  %v659_v2 = vld [vmem:[#allocation10 + $0x2b8] sm:$0xff] }
 0x12c   :  { %521 = vmatprep.subr.mxu1 %v301_v3  ;;  %v594_v3 = vld [vmem:[#allocation10 + $0xb0] sm:$0xff] }
 0x12d   :  { %522 = vmatpush1.msra.mxu1 %v300_v4  ;;  %v658_v4 = vld [vmem:[#allocation10 + $0x2b0] sm:$0xff] }
 0x12e   :  { %523 = vmatprep.subr.mxu1 %v297_v5  ;;  %v593_v5 = vld [vmem:[#allocation10 + $0xa8] sm:$0xff] }
 0x12f   :  { %524 = vmatpush1.msra.mxu1 %v296_v6  ;;  %v657_v6 = vld [vmem:[#allocation10 + $0x2a8] sm:$0xff] }
 0x130   :  { %525 = vmatprep.subr.mxu1 %v293_v7  ;;  %v592_v7 = vld [vmem:[#allocation10 + $0xa0] sm:$0xff] }
 0x131   :  { %526 = vmatpush1.msra.mxu1 %v292_v8  ;;  %v656_v8 = vld [vmem:[#allocation10 + $0x2a0] sm:$0xff] }
 0x132   :  { %527 = vmatprep.subr.mxu1 %v417_v9  ;;  %v591_v9 = vld [vmem:[#allocation10 + $0x98] sm:$0xff] }
 0x133   :  { %528 = vmatpush2.msra.mxu1 %v416_v10  ;;  %v655_v10 = vld [vmem:[#allocation10 + $0x298] sm:$0xff] }
 0x134   :  { %529 = vmatprep.subr.mxu1 %v413_v11  ;;  %v590_v11 = vld [vmem:[#allocation10 + $0x90] sm:$0xff] }
 0x135   :  { %530 = vmatpush2.msra.mxu1 %v412_v12  ;;  %v654_v12 = vld [vmem:[#allocation10 + $0x290] sm:$0xff] }
 0x136   :  { %531 = vmatprep.subr.mxu1 %v409_v13  ;;  %v589_v13 = vld [vmem:[#allocation10 + $0x88] sm:$0xff] }
 0x137   :  { %532 = vmatpush2.msra.mxu1 %v408_v14  ;;  %v653_v14 = vld [vmem:[#allocation10 + $0x288] sm:$0xff] }
 0x138   :  { %533 = vmatprep.subr.mxu1 %v405_v15  ;;  %v588_v15 = vld [vmem:[#allocation10 + $0x80] sm:$0xff] }
 0x139   :  { %534 = vmatpush2.msra.mxu1 %v404_v16  ;;  %v652_v16 = vld [vmem:[#allocation10 + $0x280] sm:$0xff] }
 0x13a   :  { %535 = vmatprep.subr.mxu1 %v401_v17  ;;  %v587_v17 = vld [vmem:[#allocation10 + $0x78] sm:$0xff] }
 0x13b   :  { %536 = vmatpush2.msra.mxu1 %v400_v18  ;;  %v651_v18 = vld [vmem:[#allocation10 + $0x278] sm:$0xff] }
 0x13c   :  { %537 = vmatprep.subr.mxu1 %v397_v19  ;;  %v586_v19 = vld [vmem:[#allocation10 + $0x70] sm:$0xff] }
 0x13d   :  { %538 = vmatpush2.msra.mxu1 %v396_v20  ;;  %v650_v20 = vld [vmem:[#allocation10 + $0x270] sm:$0xff] }
 0x13e   :  { %539 = vmatprep.subr.mxu1 %v393_v21  ;;  %v585_v21 = vld [vmem:[#allocation10 + $0x68] sm:$0xff] }
 0x13f   :  { %540 = vmatpush2.msra.mxu1 %v392_v22  ;;  %v649_v22 = vld [vmem:[#allocation10 + $0x268] sm:$0xff] }
 0x140   :  { %541 = vmatprep.subr.mxu1 %v389_v23  ;;  %v584_v23 = vld [vmem:[#allocation10 + $0x60] sm:$0xff] }
 0x141   :  { %542 = vmatpush2.msra.mxu1 %v388_v24  ;;  %v648_v24 = vld [vmem:[#allocation10 + $0x260] sm:$0xff] }
 0x142   :  { %543 = vmatprep.subr.mxu1 %v385_v25  ;;  %v583_v25 = vld [vmem:[#allocation10 + $0x58] sm:$0xff] }
 0x143   :  { %544 = vmatpush2.msra.mxu1 %v384_v26  ;;  %v647_v26 = vld [vmem:[#allocation10 + $0x258] sm:$0xff] }
 0x144   :  { %545 = vmatprep.subr.mxu1 %v381_v27  ;;  %v582_v27 = vld [vmem:[#allocation10 + $0x50] sm:$0xff] }
 0x145   :  { %546 = vmatpush2.msra.mxu1 %v380_v28  ;;  %v646_v28 = vld [vmem:[#allocation10 + $0x250] sm:$0xff] }
 0x146   :  { %547 = vmatprep.subr.mxu1 %v377_v29  ;;  %v581_v29 = vld [vmem:[#allocation10 + $0x48] sm:$0xff] }
 0x147   :  { %548 = vmatpush2.msra.mxu1 %v376_v30  ;;  %v645_v30 = vld [vmem:[#allocation10 + $0x248] sm:$0xff] }
 0x148   :  { %549 = vmatprep.subr.mxu1 %v373_v31  ;;  %v580_v31 = vld [vmem:[#allocation10 + $0x40] sm:$0xff] }
 0x149   :  { %550 = vmatpush2.msra.mxu1 %v372_v32  ;;  %v644_v32 = vld [vmem:[#allocation10 + $0x240] sm:$0xff] }
 0x14a   :  { %551 = vmatprep.subr.mxu1 %v369_v33  ;;  %v579_v33 = vld [vmem:[#allocation10 + $0x38] sm:$0xff] }
 0x14b   :  { %552 = vmatpush2.msra.mxu1 %v368_v34  ;;  %v643_v34 = vld [vmem:[#allocation10 + $0x238] sm:$0xff] }
 0x14c   :  { %553 = vmatprep.subr.mxu1 %v365_v35  ;;  %v578_v35 = vld [vmem:[#allocation10 + $0x30] sm:$0xff] }
 0x14d   :  { %554 = vmatpush2.msra.mxu1 %v364_v36  ;;  %v642_v36 = vld [vmem:[#allocation10 + $0x230] sm:$0xff] }
 0x14e   :  { %555 = vmatprep.subr.mxu1 %v361_v38  ;;  %v641_v38 = vld [vmem:[#allocation10 + $0x228] sm:$0xff] }
 0x14f   :  { %556 = vmatpush2.msra.mxu1 %v360_v40  ;;  %v640_v40 = vld [vmem:[#allocation10 + $0x220] sm:$0xff] }
 0x150   :  { %557 = vmatprep.subr.mxu1 %v357_v43  ;;  %v639_v43 = vld [vmem:[#allocation10 + $0x218] sm:$0xff] }
 0x151   :  { %558 = vmatpush2.msra.mxu1 %v356_v45  ;;  %v638_v45 = vld [vmem:[#allocation10 + $0x210] sm:$0xff] }
 0x152   :  { %777 = vmatprep.subr.mxu1 %v667_v47  ;;  %v637_v47 = vld [vmem:[#allocation10 + $0x208] sm:$0xff] }
 0x1d2   :  { %v279_v48 = vpop.f32.mrf.mxu1 }
 0x1d4   :  { %v281_v49 = vpop.f32.mrf.mxu1 }
 0x1d5   :  { %482 = vmatprep.mubr.f32.mxu0 %v281_v49  ;;  %559 = vmatprep.mubr.f32.mxu1 %v281_v49  ;;  %v636_v49 = vld [vmem:[#allocation10 + $0x200] sm:$0xff] }
 0x1d6   :  { %v285_v54 = vpop.f32.mrf.mxu1  ;;  %483 = vmatmul.mubr.f32.vlgmr.msra.gmra.mxu0 %v279_v48  ;;  %560 = vmatmul.mubr.f32.vlgmr.msra.gmra.mxu1 %v279_v48  ;;  %v572_v48 = vld [vmem:[#allocation10] sm:$0xff] }
 0x1d7   :  { %701 = vmatpush1.msra.mxu0 %v602_v50  ;;  %778 = vmatpush1.msra.mxu1 %v666_v51  ;;  %v635_v50 = vld [vmem:[#allocation10 + $0x1f8] sm:$0xff] }
 0x1d8   :  { %v287_v42 = vpop.f32.mrf.mxu1  ;;  %702 = vmatprep.subr.mxu0 %v601_v52  ;;  %779 = vmatprep.subr.mxu1 %v665_v53  ;;  %v699_v51 = vld [vmem:[#allocation10 + $0x3f8] sm:$0xff]  ;;  %v634_v52 = vld [vmem:[#allocation10 + $0x1f0] sm:$0xff] }
 0x1d9   :  { %488 = vmatprep.mubr.f32.mxu0 %v287_v42  ;;  %565 = vmatprep.mubr.f32.mxu1 %v287_v42  ;;  %v698_v53 = vld [vmem:[#allocation10 + $0x3f0] sm:$0xff]  ;;  %v697_v42 = vld [vmem:[#allocation10 + $0x3e8] sm:$0xff] }
 0x1da   :  { %489 = vmatmul.mubr.f32.gmra.mxu0 %v285_v54  ;;  %566 = vmatmul.mubr.f32.gmra.mxu1 %v285_v54  ;;  %v633_v54 = vld [vmem:[#allocation10 + $0x1e8] sm:$0xff] }
 0x1db   :  { %703 = vmatpush1.msra.mxu0 %v600_v55  ;;  %780 = vmatpush1.msra.mxu1 %v664_v56  ;;  %v632_v55 = vld [vmem:[#allocation10 + $0x1e0] sm:$0xff] }
 0x1dc   :  { %704 = vmatprep.subr.mxu0 %v599_v57  ;;  %781 = vmatprep.subr.mxu1 %v663_v58  ;;  %v696_v56 = vld [vmem:[#allocation10 + $0x3e0] sm:$0xff]  ;;  %v631_v57 = vld [vmem:[#allocation10 + $0x1d8] sm:$0xff] }
 0x1dd   :  { %705 = vmatpush1.msra.mxu0 %v598_v59  ;;  %782 = vmatpush1.msra.mxu1 %v662_v60  ;;  %v695_v58 = vld [vmem:[#allocation10 + $0x3d8] sm:$0xff]  ;;  %v630_v59 = vld [vmem:[#allocation10 + $0x1d0] sm:$0xff] }
 0x1de   :  { %706 = vmatprep.subr.mxu0 %v597_v61  ;;  %783 = vmatprep.subr.mxu1 %v661_v62  ;;  %v694_v60 = vld [vmem:[#allocation10 + $0x3d0] sm:$0xff]  ;;  %v629_v61 = vld [vmem:[#allocation10 + $0x1c8] sm:$0xff] }
 0x1df   :  { %707 = vmatpush1.msra.mxu0 %v596_v63  ;;  %784 = vmatpush1.msra.mxu1 %v660_v0  ;;  %v693_v62 = vld [vmem:[#allocation10 + $0x3c8] sm:$0xff]  ;;  %v628_v63 = vld [vmem:[#allocation10 + $0x1c0] sm:$0xff] }
 0x1e0   :  { %708 = vmatprep.subr.mxu0 %v595_v1  ;;  %785 = vmatprep.subr.mxu1 %v659_v2  ;;  %v692_v0 = vld [vmem:[#allocation10 + $0x3c0] sm:$0xff]  ;;  %v627_v1 = vld [vmem:[#allocation10 + $0x1b8] sm:$0xff] }
 0x1e1   :  { %709 = vmatpush1.msra.mxu0 %v594_v3  ;;  %786 = vmatpush1.msra.mxu1 %v658_v4  ;;  %v691_v2 = vld [vmem:[#allocation10 + $0x3b8] sm:$0xff]  ;;  %v626_v3 = vld [vmem:[#allocation10 + $0x1b0] sm:$0xff] }
 0x1e2   :  { %710 = vmatprep.subr.mxu0 %v593_v5  ;;  %787 = vmatprep.subr.mxu1 %v657_v6  ;;  %v690_v4 = vld [vmem:[#allocation10 + $0x3b0] sm:$0xff]  ;;  %v625_v5 = vld [vmem:[#allocation10 + $0x1a8] sm:$0xff] }
 0x1e3   :  { %711 = vmatpush1.msra.mxu0 %v592_v7  ;;  %788 = vmatpush1.msra.mxu1 %v656_v8  ;;  %v689_v6 = vld [vmem:[#allocation10 + $0x3a8] sm:$0xff]  ;;  %v624_v7 = vld [vmem:[#allocation10 + $0x1a0] sm:$0xff] }
 0x1e4   :  { %712 = vmatprep.subr.mxu0 %v591_v9  ;;  %789 = vmatprep.subr.mxu1 %v655_v10  ;;  %v688_v8 = vld [vmem:[#allocation10 + $0x3a0] sm:$0xff]  ;;  %v623_v9 = vld [vmem:[#allocation10 + $0x198] sm:$0xff] }
 0x1e5   :  { %713 = vmatpush1.msra.mxu0 %v590_v11  ;;  %790 = vmatpush1.msra.mxu1 %v654_v12  ;;  %v687_v10 = vld [vmem:[#allocation10 + $0x398] sm:$0xff]  ;;  %v622_v11 = vld [vmem:[#allocation10 + $0x190] sm:$0xff] }
 0x1e6   :  { %714 = vmatprep.subr.mxu0 %v589_v13  ;;  %791 = vmatprep.subr.mxu1 %v653_v14  ;;  %v686_v12 = vld [vmem:[#allocation10 + $0x390] sm:$0xff]  ;;  %v621_v13 = vld [vmem:[#allocation10 + $0x188] sm:$0xff] }
 0x1e7   :  { %715 = vmatpush1.msra.mxu0 %v588_v15  ;;  %792 = vmatpush1.msra.mxu1 %v652_v16  ;;  %v685_v14 = vld [vmem:[#allocation10 + $0x388] sm:$0xff]  ;;  %v620_v15 = vld [vmem:[#allocation10 + $0x180] sm:$0xff] }
 0x1e8   :  { %716 = vmatprep.subr.mxu0 %v587_v17  ;;  %793 = vmatprep.subr.mxu1 %v651_v18  ;;  %v684_v16 = vld [vmem:[#allocation10 + $0x380] sm:$0xff]  ;;  %v619_v17 = vld [vmem:[#allocation10 + $0x178] sm:$0xff] }
 0x1e9   :  { %717 = vmatpush1.msra.mxu0 %v586_v19  ;;  %794 = vmatpush1.msra.mxu1 %v650_v20  ;;  %v683_v18 = vld [vmem:[#allocation10 + $0x378] sm:$0xff]  ;;  %v618_v19 = vld [vmem:[#allocation10 + $0x170] sm:$0xff] }
 0x1ea   :  { %718 = vmatprep.subr.mxu0 %v585_v21  ;;  %795 = vmatprep.subr.mxu1 %v649_v22  ;;  %v682_v20 = vld [vmem:[#allocation10 + $0x370] sm:$0xff]  ;;  %v617_v21 = vld [vmem:[#allocation10 + $0x168] sm:$0xff] }
 0x1eb   :  { %719 = vmatpush1.msra.mxu0 %v584_v23  ;;  %796 = vmatpush1.msra.mxu1 %v648_v24  ;;  %v681_v22 = vld [vmem:[#allocation10 + $0x368] sm:$0xff]  ;;  %v616_v23 = vld [vmem:[#allocation10 + $0x160] sm:$0xff] }
 0x1ec   :  { %720 = vmatprep.subr.mxu0 %v583_v25  ;;  %797 = vmatprep.subr.mxu1 %v647_v26  ;;  %v680_v24 = vld [vmem:[#allocation10 + $0x360] sm:$0xff]  ;;  %v615_v25 = vld [vmem:[#allocation10 + $0x158] sm:$0xff] }
 0x1ed   :  { %721 = vmatpush1.msra.mxu0 %v582_v27  ;;  %798 = vmatpush1.msra.mxu1 %v646_v28  ;;  %v679_v26 = vld [vmem:[#allocation10 + $0x358] sm:$0xff]  ;;  %v614_v27 = vld [vmem:[#allocation10 + $0x150] sm:$0xff] }
 0x1ee   :  { %722 = vmatprep.subr.mxu0 %v581_v29  ;;  %799 = vmatprep.subr.mxu1 %v645_v30  ;;  %v678_v28 = vld [vmem:[#allocation10 + $0x350] sm:$0xff]  ;;  %v613_v29 = vld [vmem:[#allocation10 + $0x148] sm:$0xff] }
 0x1ef   :  { %723 = vmatpush1.msra.mxu0 %v580_v31  ;;  %800 = vmatpush1.msra.mxu1 %v644_v32  ;;  %v677_v30 = vld [vmem:[#allocation10 + $0x348] sm:$0xff]  ;;  %v612_v31 = vld [vmem:[#allocation10 + $0x140] sm:$0xff] }
 0x1f0   :  { %724 = vmatprep.subr.mxu0 %v579_v33  ;;  %801 = vmatprep.subr.mxu1 %v643_v34  ;;  %v676_v32 = vld [vmem:[#allocation10 + $0x340] sm:$0xff]  ;;  %v611_v33 = vld [vmem:[#allocation10 + $0x138] sm:$0xff] }
 0x1f1   :  { %725 = vmatpush1.msra.mxu0 %v578_v35  ;;  %802 = vmatpush1.msra.mxu1 %v642_v36  ;;  %v675_v34 = vld [vmem:[#allocation10 + $0x338] sm:$0xff]  ;;  %v610_v35 = vld [vmem:[#allocation10 + $0x130] sm:$0xff] }
 0x1f2   :  { %726 = vmatprep.subr.mxu0 %v577_v37  ;;  %803 = vmatprep.subr.mxu1 %v641_v38  ;;  %v674_v36 = vld [vmem:[#allocation10 + $0x330] sm:$0xff]  ;;  %v609_v37 = vld [vmem:[#allocation10 + $0x128] sm:$0xff] }
 0x1f3   :  { %727 = vmatpush1.msra.mxu0 %v576_v39  ;;  %804 = vmatpush1.msra.mxu1 %v640_v40  ;;  %v673_v38 = vld [vmem:[#allocation10 + $0x328] sm:$0xff]  ;;  %v608_v39 = vld [vmem:[#allocation10 + $0x120] sm:$0xff] }
 0x1f4   :  { %728 = vmatprep.subr.mxu0 %v575_v41  ;;  %805 = vmatprep.subr.mxu1 %v639_v43  ;;  %v672_v40 = vld [vmem:[#allocation10 + $0x320] sm:$0xff]  ;;  %v607_v41 = vld [vmem:[#allocation10 + $0x118] sm:$0xff] }
 0x1f5   :  { %729 = vmatpush1.msra.mxu0 %v574_v44  ;;  %806 = vmatpush1.msra.mxu1 %v638_v45  ;;  %v671_v43 = vld [vmem:[#allocation10 + $0x318] sm:$0xff]  ;;  %v606_v44 = vld [vmem:[#allocation10 + $0x110] sm:$0xff] }
 0x1f6   :  { %730 = vmatprep.subr.mxu0 %v573_v46  ;;  %807 = vmatprep.subr.mxu1 %v637_v47  ;;  %v670_v45 = vld [vmem:[#allocation10 + $0x310] sm:$0xff]  ;;  %v605_v46 = vld [vmem:[#allocation10 + $0x108] sm:$0xff] }
 0x1f7   :  { %731 = vmatpush1.msra.mxu0 %v572_v48  ;;  %808 = vmatpush1.msra.mxu1 %v636_v49  ;;  %v669_v47 = vld [vmem:[#allocation10 + $0x308] sm:$0xff]  ;;  %v604_v48 = vld [vmem:[#allocation10 + $0x100] sm:$0xff] }
 0x1f8   :  { %732 = vmatprep.subr.mxu0 %v635_v50  ;;  %809 = vmatprep.subr.mxu1 %v699_v51  ;;  %v668_v49 = vld [vmem:[#allocation10 + $0x300] sm:$0xff] }
 0x1f9   :  { %733 = vmatpush2.msra.mxu0 %v634_v52  ;;  %810 = vmatpush2.msra.mxu1 %v698_v53 }
 0x1fa   :  { %734 = vmatprep.subr.mxu0 %v633_v54  ;;  %811 = vmatprep.subr.mxu1 %v697_v42 }
 0x1fb   :  { %735 = vmatpush2.msra.mxu0 %v632_v55  ;;  %812 = vmatpush2.msra.mxu1 %v696_v56 }
 0x1fc   :  { %736 = vmatprep.subr.mxu0 %v631_v57  ;;  %813 = vmatprep.subr.mxu1 %v695_v58 }
 0x1fd   :  { %737 = vmatpush2.msra.mxu0 %v630_v59  ;;  %814 = vmatpush2.msra.mxu1 %v694_v60 }
 0x1fe   :  { %738 = vmatprep.subr.mxu0 %v629_v61  ;;  %815 = vmatprep.subr.mxu1 %v693_v62 }
 0x1ff   :  { %739 = vmatpush2.msra.mxu0 %v628_v63  ;;  %816 = vmatpush2.msra.mxu1 %v692_v0 }
 0x200   :  { %740 = vmatprep.subr.mxu0 %v627_v1  ;;  %817 = vmatprep.subr.mxu1 %v691_v2 }
 0x201   :  { %741 = vmatpush2.msra.mxu0 %v626_v3  ;;  %818 = vmatpush2.msra.mxu1 %v690_v4 }
 0x202   :  { %742 = vmatprep.subr.mxu0 %v625_v5  ;;  %819 = vmatprep.subr.mxu1 %v689_v6 }
 0x203   :  { %743 = vmatpush2.msra.mxu0 %v624_v7  ;;  %820 = vmatpush2.msra.mxu1 %v688_v8 }
 0x204   :  { %744 = vmatprep.subr.mxu0 %v623_v9  ;;  %821 = vmatprep.subr.mxu1 %v687_v10 }
 0x205   :  { %745 = vmatpush2.msra.mxu0 %v622_v11  ;;  %822 = vmatpush2.msra.mxu1 %v686_v12 }
 0x206   :  { %746 = vmatprep.subr.mxu0 %v621_v13  ;;  %823 = vmatprep.subr.mxu1 %v685_v14 }
 0x207   :  { %747 = vmatpush2.msra.mxu0 %v620_v15  ;;  %824 = vmatpush2.msra.mxu1 %v684_v16 }
 0x208   :  { %748 = vmatprep.subr.mxu0 %v619_v17  ;;  %825 = vmatprep.subr.mxu1 %v683_v18 }
 0x209   :  { %749 = vmatpush2.msra.mxu0 %v618_v19  ;;  %826 = vmatpush2.msra.mxu1 %v682_v20 }
 0x20a   :  { %750 = vmatprep.subr.mxu0 %v617_v21  ;;  %827 = vmatprep.subr.mxu1 %v681_v22 }
 0x20b   :  { %751 = vmatpush2.msra.mxu0 %v616_v23  ;;  %828 = vmatpush2.msra.mxu1 %v680_v24 }
 0x20c   :  { %752 = vmatprep.subr.mxu0 %v615_v25  ;;  %829 = vmatprep.subr.mxu1 %v679_v26 }
 0x20d   :  { %753 = vmatpush2.msra.mxu0 %v614_v27  ;;  %830 = vmatpush2.msra.mxu1 %v678_v28 }
 0x20e   :  { %754 = vmatprep.subr.mxu0 %v613_v29  ;;  %831 = vmatprep.subr.mxu1 %v677_v30 }
 0x20f   :  { %755 = vmatpush2.msra.mxu0 %v612_v31  ;;  %832 = vmatpush2.msra.mxu1 %v676_v32 }
 0x210   :  { %756 = vmatprep.subr.mxu0 %v611_v33  ;;  %833 = vmatprep.subr.mxu1 %v675_v34 }
 0x211   :  { %757 = vmatpush2.msra.mxu0 %v610_v35  ;;  %834 = vmatpush2.msra.mxu1 %v674_v36 }
 0x212   :  { %758 = vmatprep.subr.mxu0 %v609_v37  ;;  %835 = vmatprep.subr.mxu1 %v673_v38 }
 0x213   :  { %759 = vmatpush2.msra.mxu0 %v608_v39  ;;  %836 = vmatpush2.msra.mxu1 %v672_v40 }
 0x214   :  { %760 = vmatprep.subr.mxu0 %v607_v41  ;;  %837 = vmatprep.subr.mxu1 %v671_v43 }
 0x215   :  { %761 = vmatpush2.msra.mxu0 %v606_v44  ;;  %838 = vmatpush2.msra.mxu1 %v670_v45 }
 0x216   :  { %762 = vmatprep.subr.mxu0 %v605_v46  ;;  %839 = vmatprep.subr.mxu1 %v669_v47 }
 0x217   :  { %763 = vmatpush2.msra.mxu0 %v604_v48  ;;  %840 = vmatpush2.msra.mxu1 %v668_v49 }
 0x296   :  { %v484_v50 = vpop.f32.mrf.mxu0  ;;  %v561_v51 = vpop.f32.mrf.mxu1 }
 0x298   :  { %v486_v52 = vpop.f32.mrf.mxu0  ;;  %v563_v53 = vpop.f32.mrf.mxu1 }
 0x299   :  { %764 = vmatprep.mubr.f32.mxu0 %v486_v52  ;;  %841 = vmatprep.mubr.f32.mxu1 %v563_v53 }
 0x29a   :  { %v490_v54 = vpop.f32.mrf.mxu0  ;;  %v567_v42 = vpop.f32.mrf.mxu1  ;;  %765 = vmatmul.mubr.f32.vlgmr.msra.gmra.mxu0 %v484_v50  ;;  %842 = vmatmul.mubr.f32.vlgmr.msra.gmra.mxu1 %v561_v51 }
 0x29c   :  { %v492_v55 = vpop.f32.mrf.mxu0  ;;  %v569_v56 = vpop.f32.mrf.mxu1 }
 0x29d   :  { %770 = vmatprep.mubr.f32.mxu0 %v492_v55  ;;  %847 = vmatprep.mubr.f32.mxu1 %v569_v56 }
 0x29e   :  { %771 = vmatmul.mubr.f32.gmra.mxu0 %v490_v54  ;;  %848 = vmatmul.mubr.f32.gmra.mxu1 %v567_v42 }
 0x35a   :  { %v766_v57 = vpop.f32.mrf.mxu0  ;;  %v843_v58 = vpop.f32.mrf.mxu1 }
 0x35b   :  { %v844_v59 = vadd.f32 %v843_v58, %v766_v57 }
 0x35c   :  { %v768_v60 = vpop.f32.mrf.mxu0  ;;  %v845_v61 = vpop.f32.mrf.mxu1 }
 0x35d   :  { %v854_v62 = vmax.f32 %v844_v59, 0.0  ;;  %v846_v63 = vadd.f32 %v845_v61, %v768_v60 }
 0x35e   :  { %v772_v0 = vpop.f32.mrf.mxu0  ;;  %v849_v1 = vpop.f32.mrf.mxu1 }
 0x35f   :  { %858 = vst [vmem:[#allocation11] sm:$0xff] %v854_v62  ;;  %v855_v2 = vmax.f32 %v846_v63, 0.0  ;;  %v850_v3 = vadd.f32 %v849_v1, %v772_v0 }
 0x360   :  { %v774_v4 = vpop.f32.mrf.mxu0  ;;  %v851_v5 = vpop.f32.mrf.mxu1 }
 0x361   :  { %859 = vst [vmem:[#allocation11 + $0x8] sm:$0xff] %v855_v2  ;;  %v856_v6 = vmax.f32 %v850_v3, 0.0  ;;  %v852_v7 = vadd.f32 %v851_v5, %v774_v4 }
 0x363   :  { %860 = vst [vmem:[#allocation11 + $0x10] sm:$0xff] %v856_v6  ;;  %v857_v8 = vmax.f32 %v852_v7, 0.0 }
 0x365   :  { %861 = vst [vmem:[#allocation11 + $0x18] sm:$0xff] %v857_v8 }
 0x366   :  { %1036 = shalt.err (!%p1033_p1)
}
 0x367   :  { %873 = dma.vmem_to_hbm [thread:$0]  %s868_s4, 512, %s1132_s5, [#allocation4], %s1061_s3, %s1061_s3, %s1062_s14  }
 0x368   :  { %1051 = dma.done.wait [#allocation4], 512  }
 0x369   :  { %1052 = vsyncadd [#allocation4], 4294966784 }
 0x36a   :  { %877 = vsyncpa [#allocation3], 1 }
 0x36b   :  { %878 = vsyncpa [#allocation6], 1 }
 0x36c   :  { %879 = vsyncpa [#allocation9], 1 }
 0x36d   :  { %880 = vsyncpa [#allocation4], 1 }

</bundles_post_ra>
